<compile_context>
chip_gen: v7x
topology: tpu7x:2x2x1
jax: 0.10.0
libtpu: 0.0.40
codegen_flags: <defaults>
</compile_context>

<pallas_src>
import jax
import jax.numpy as jnp
from jax.experimental import pallas as pl
from jax.experimental.pallas import tpu as pltpu

_LANE = 512            # lane-dense last dim (multiple of 128)
_MAX_TILE_ROWS = 4096  # 4096 * 512 * 4 B = 8 MiB per input tile
_NCORES = 2            # leading "parallel" grid axis (v7x megacore split)


def _partial_sum_kernel(x_ref, out_ref, acc_ref):
    """Accumulate a (8, LANE) vector partial sum per core; write it once."""
    step = pl.program_id(1)

    @pl.when(step == 0)
    def _init():
        acc_ref[...] = jnp.zeros_like(acc_ref)

    tile = x_ref[...]                                    # (TR, LANE) f32
    # VPU-only fold: group rows into (TR//8, 8, LANE) vreg slabs and add them.
    acc_ref[...] += jnp.sum(tile.reshape(-1, 8, tile.shape[-1]), axis=0)

    @pl.when(step == pl.num_programs(1) - 1)
    def _finalize():
        out_ref[...] = acc_ref[...]                      # lane-dense store


def mean_all_reduce(x: jax.Array,
                    *,
                    lane_width: int = _LANE,
                    max_tile_rows: int = _MAX_TILE_ROWS) -> jax.Array:
    """Mean over all elements of a rank-3 array (aten.mean(x, (0, 1, 2)))."""
    assert x.ndim == 3, "expected rank-3 input"
    d0, d1, d2 = x.shape
    n = d0 * d1 * d2
    x = x.astype(jnp.float32)

    c = lane_width
    rows = -(-n // c)                               # cdiv(n, c)
    rows_per_core = -(-rows // _NCORES)
    tr = max(8, min(max_tile_rows, ((rows_per_core + 7) // 8) * 8))
    steps = -(-rows_per_core // tr)                 # reduction steps per core
    total_rows = _NCORES * steps * tr
    padded_n = total_rows * c

    x_flat = x.reshape(-1)
    if padded_n != n:
        # Zero padding does not change the sum; divisor stays the true count.
        x_flat = jnp.pad(x_flat, (0, padded_n - n))
    x2d = x_flat.reshape(total_rows, c)

    partials = pl.pallas_call(
        _partial_sum_kernel,
        out_shape=jax.ShapeDtypeStruct((_NCORES * 8, c), jnp.float32),
        grid_spec=pltpu.PrefetchScalarGridSpec(
            num_scalar_prefetch=0,
            grid=(_NCORES, steps),
            in_specs=[
                # Each core owns a contiguous band of row-blocks.
                pl.BlockSpec((tr, c), lambda core, s: (core * steps + s, 0)),
            ],
            # One (8, LANE) partial-sum slab per core (lane-dense output).
            out_specs=pl.BlockSpec((8, c), lambda core, s: (core, 0)),
            scratch_shapes=[pltpu.VMEM((8, c), jnp.float32)],
        ),
        compiler_params=pltpu.CompilerParams(
            dimension_semantics=("parallel", "arbitrary"),
            vmem_limit_bytes=32 * 1024 * 1024,
        ),
        cost_estimate=pl.CostEstimate(
            flops=padded_n, transcendentals=0, bytes_accessed=padded_n * 4),
    )(x2d)

    # Tiny final cross-lane reduce + divide by the TRUE element count, done
    # in the wrapper (kept off the kernel's per-step critical path).
    return jnp.sum(partials) * jnp.float32(1.0 / n)


if __name__ == "__main__":
    key = jax.random.PRNGKey(0)
    k0, k1 = jax.random.split(key)

    # Small rank-3 shapes consistent with the module's ([-1,-1,-1], f32) arg.
    x = jax.random.normal(k0, (4, 8, 16), dtype=jnp.float32)
    result = mean_all_reduce(x)
    jax.block_until_ready(result)
    ref = jnp.mean(x)
    assert result.shape == ()
    assert jnp.allclose(result, ref, atol=1e-5, rtol=1e-5), (result, ref)

    # Odd shape: exercises zero padding, multiple reduction steps per core,
    # and the two-core partial-sum path.
    x2 = jax.random.normal(k1, (7, 33, 65), dtype=jnp.float32)
    result2 = mean_all_reduce(x2, max_tile_rows=8)
    jax.block_until_ready(result2)
    ref2 = jnp.mean(x2)
    assert jnp.allclose(result2, ref2, atol=1e-5, rtol=1e-5), (result2, ref2)

    print("KERNEL_OK")
</pallas_src>

<mosaic_0001>
module attributes {stable_mosaic.version = 11 : i64} {
  func.func @_partial_sum_kernel(%arg0: i32, %arg1: i32, %arg2: memref<8x512xf32, #tpu.memory_space<vmem>>, %arg3: memref<8x512xf32, #tpu.memory_space<vmem>>, %arg4: memref<8x512xf32, #tpu.memory_space<vmem>>) attributes {dimension_semantics = [#tpu.dimension_semantics<parallel>, #tpu.dimension_semantics<arbitrary>], iteration_bounds = array<i64: 2, 1>, scalar_prefetch = 0 : i64, scratch_operands = 1 : i64, tpu.core_type = #tpu.core_type<tc>, window_params = [{transform_indices = @transform_0, window_bounds = array<i64: 8, 512>}, {transform_indices = @transform_1, window_bounds = array<i64: 8, 512>}]} {
    %c0_i32 = arith.constant 0 : i32
    %0 = arith.cmpi eq, %arg1, %c0_i32 : i32
    %1 = arith.extui %0 : i1 to i32
    %c0_i32_0 = arith.constant 0 : i32
    %2 = arith.cmpi ne, %1, %c0_i32_0 : i32
    scf.if %2 {
      %cst_8 = arith.constant 0.000000e+00 : f32
      %12 = vector.broadcast %cst_8 : f32 to vector<8x512xf32>
      %c0_9 = arith.constant 0 : index
      %c0_10 = arith.constant 0 : index
      %13 = vector.load %arg4[%c0_9, %c0_10] : memref<8x512xf32, #tpu.memory_space<vmem>>, vector<8x512xf32>
      tpu.vector_store %arg4[%c0_9, %c0_10], %12 {strides = array<i32>} : memref<8x512xf32, #tpu.memory_space<vmem>>, vector<8x512xf32>,
    } else {
    }
    %c0 = arith.constant 0 : index
    %c0_1 = arith.constant 0 : index
    %3 = vector.load %arg2[%c0, %c0_1] : memref<8x512xf32, #tpu.memory_space<vmem>>, vector<8x512xf32>
    %c0_2 = arith.constant 0 : index
    %c0_3 = arith.constant 0 : index
    %4 = vector.load %arg4[%c0_2, %c0_3] : memref<8x512xf32, #tpu.memory_space<vmem>>, vector<8x512xf32>
    %5 = vector.shape_cast %3 : vector<8x512xf32> to vector<1x8x512xf32>
    %cst = arith.constant dense<0.000000e+00> : vector<8x512xf32>
    %6 = vector.multi_reduction <add>, %5, %cst [0] : vector<1x8x512xf32> to vector<8x512xf32>
    %7 = arith.addf %4, %6 : vector<8x512xf32>
    %c0_4 = arith.constant 0 : index
    %c0_5 = arith.constant 0 : index
    %8 = vector.load %arg4[%c0_4, %c0_5] : memref<8x512xf32, #tpu.memory_space<vmem>>, vector<8x512xf32>
    tpu.vector_store %arg4[%c0_4, %c0_5], %7 {strides = array<i32>} : memref<8x512xf32, #tpu.memory_space<vmem>>, vector<8x512xf32>,
    %c0_i32_6 = arith.constant 0 : i32
    %9 = arith.cmpi eq, %arg1, %c0_i32_6 : i32
    %10 = arith.extui %9 : i1 to i32
    %c0_i32_7 = arith.constant 0 : i32
    %11 = arith.cmpi ne, %10, %c0_i32_7 : i32
    scf.if %11 {
      %c0_8 = arith.constant 0 : index
      %c0_9 = arith.constant 0 : index
      %12 = vector.load %arg4[%c0_8, %c0_9] : memref<8x512xf32, #tpu.memory_space<vmem>>, vector<8x512xf32>
      %c0_10 = arith.constant 0 : index
      %c0_11 = arith.constant 0 : index
      %13 = vector.load %arg3[%c0_10, %c0_11] : memref<8x512xf32, #tpu.memory_space<vmem>>, vector<8x512xf32>
      tpu.vector_store %arg3[%c0_10, %c0_11], %12 {strides = array<i32>} : memref<8x512xf32, #tpu.memory_space<vmem>>, vector<8x512xf32>,
    } else {
    }
    return
  }
  func.func @transform_0(%arg0: i32, %arg1: i32) -> (i32, i32) {
    %c1_i32 = arith.constant 1 : i32
    %0 = arith.muli %arg0, %c1_i32 : i32
    %1 = arith.addi %0, %arg1 : i32
    %c0_i32 = arith.constant 0 : i32
    %c0_i32_0 = arith.constant 0 : i32
    return %1, %c0_i32 : i32, i32
  }
  func.func @transform_1(%arg0: i32, %arg1: i32) -> (i32, i32) {
    %c0_i32 = arith.constant 0 : i32
    %c0_i32_0 = arith.constant 0 : i32
    return %arg0, %c0_i32 : i32, i32
  }
}

</mosaic_0001>

<bundles_post_ra>
// kernel: tpu_custom_call.1
= control target key start
LH: loop header
LB: loop body
LE: loop exit
PB: predicated region body
PF: predicated region fallthrough
CT: control target
= control target key end

     0   :  { %6 = vsyncpa [#allocation4], 0  ;;  %s659_s0 = inlined_call_operand.hbm [shape: f32[16,512], index: 0, kind: input, shape index: {}]   ;;  %s660_s1 = inlined_call_operand.hbm [shape: f32[16,512], index: 1, kind: output, shape index: {}]  }
   0x1   :  { %8 = vsyncpa [#allocation4 + $0x1], 0 }
   0x2   :  { %9 = vsyncpa [#allocation5], 0 }
   0x3   :  { %11 = vsyncpa [#allocation5 + $0x1], 0  ;;  %s487_s6 = smov 0   ;;  %s489_s7 = smov 0  }
   0x4   :  { %s491_s8 = smov 0   ;;  %s493_s9 = smov 0  }
   0x5   :  { %s495_s10 = smov 0   ;;  %s497_s11 = smov 0  }
   0x6 LB: > { %s282_s12 = sadd.s32 4294967295, %s473_s11   ;;  %s283_s13 = sadd.s32 4294967294, %s473_s11   ;;  %s473_s11 = sphi %s497_s11, %s17_s11   ;;  %s469_s10 = sphi %s495_s10, %s676_s10   ;;  %s465_s9 = sphi %s493_s9, %s675_s9   ;;  %s461_s8 = sphi %s491_s8, %s674_s8   ;;  %s457_s7 = sphi %s489_s7, %s673_s7   ;;  %s453_s6 = sphi %s487_s6, %s672_s6  }
   0x7   : > { %s29_s14 = sadd.s32 1, %s469_s10  ;;  %s38_s15 = sadd.s32 1, %s461_s8 }
   0x8   : > { %p31_p0 = scmp.ge.s32.totalorder %s29_s14, 2  ;;  %p45_p1 = scmp.ne.s32.totalorder %s461_s8, %s457_s7 }
   0x9   : > { %p46_p2 = scmp.eq.s32.totalorder %s473_s11, 0  ;;  %p51_p3 = scmp.ne.s32.totalorder %s457_s7, %s453_s6 }
   0xa   : > { %s678_s14 = smov (%p31_p0, %s29_s14), 0  ;;  %p52_p5 = scmp.eq.s32.totalorder %s282_s12, 0 }
   0xb   : > { %p528_p4 = por %p46_p2, %p45_p1  ;;  %s35_s17 = ssub.s32 %s469_s10, %s678_s14 }
   0xc   : > { %p75_p6 = scmp.eq.s32.totalorder %s282_s12, 1  ;;  %p36_p7 = scmp.eq.s32.totalorder %s35_s17, 0 }
   0xd   : > { %p534_p8 = por %p52_p5, %p51_p3  ;;  %p81_p10 = scmp.eq.s32.totalorder %s283_s13, 1 }
   0xe   : > { %p538_p9 = por %p75_p6, %p45_p1  ;;  %p311_p13 = scmp.lt.s32.totalorder %s473_s11, 2 }
   0xf   : > { %s543_s20 = scalar_select %p36_p7, %s461_s8, %s38_s15  }
  0x10   : > { %s664_s19 = scalar_select %p538_p9, 1, 0 }
  0x11   : > { %p545_p11 = por %p81_p10, %p51_p3  ;;  %s101_s22 = sand.u32 1, %s461_s8  }
  0x12   : > { %s286_s23 = sshll.u32 %s101_s22, 5  ;;  %s297_s24 = sshll.u32 %s469_s10, 9 }
  0x13   : > { %s665_s21 = scalar_select %p545_p11, 1, 0 }
  0x14   : > { %s556_s27 = scalar_lea.hbm %s659_s0, %s297_s24  ;;  %s105_s28 = scalar_lea.vmem [#allocation3], %s286_s23 }
  0x15   : > { %s114_s29 = sshll.u32 %s105_s28, 4  ;;  %p562_p0 = pnand %p311_p13, %p528_p4  ;;  %s558_s29 = int_to_ptr.vmem [resolvable:$true] %s114_s29 }
  0x16   : > { %s102_s2 = scalar_lea.sflag [#allocation4], %s101_s22  ;;  %s361_s3 = scalar_lea.hbm %s556_s27, 512 }
  0x17   : > { %p362_p3 = scmp.ne.s32.totalorder %s556_s27, %s361_s3  ;;  %p363_p5 = pneg %p562_p0 }
  0x18   : > { %s366_s12 = scalar_lea.hbm %s659_s0, 1024  ;;  %p367_p4 = scmp.lt.u32.totalorder %s556_s27, %s659_s0 }
  0x19   : > { %p364_p6 = pnand %p363_p5, %p362_p3  ;;  %p368_p10 = scmp.lt.u32.totalorder %s366_s12, %s361_s3 }
  0x1a   : > { %p370_p12 = scmp.lt.u32.totalorder %s361_s3, %s556_s27 }
  0x1b   : > { %p365_p7 = pneg %p364_p6  ;;  %p369_p13 = por %p368_p10, %p367_p4 }
  0x1d   : > { %p371_p1 = por %p370_p12, %p369_p13 }
  0x1f   : > { %p372_p2 = pnand %p371_p1, %p365_p7 }
  0x21   : > { %375 = shalt.err (!%p372_p2)
}
  0x22   : > { %s376_s16 = scalar_lea.vmem %s558_s29, 512  ;;  %s475_s17 = smov [#allocation3]  }
  0x23   : > { %p377_p3 = scmp.ne.s32.totalorder %s558_s29, %s376_s16  ;;  %s381_s22 = sshll.u32 %s475_s17, 4  ;;  %s382_s22 = int_to_ptr.vmem [resolvable:$false] %s381_s22 }
  0x24   : > { %s383_s23 = scalar_lea.vmem %s382_s22, 1024  ;;  %p384_p9 = scmp.lt.s32.totalorder %s558_s29, %s382_s22 }
  0x25   : > { %p379_p6 = pnand %p377_p3, %p363_p5  ;;  %p385_p4 = scmp.lt.s32.totalorder %s383_s23, %s376_s16 }
  0x27   : > { %p380_p11 = pneg %p379_p6  ;;  %p386_p10 = por %p385_p4, %p384_p9 }
  0x29   : > { %p387_p12 = pnand %p386_p10, %p380_p11 }
  0x2b   : > { %390 = shalt.err (!%p387_p12)
}
  0x2c   : > { %306 = dma.hbm_to_vmem [thread:$0]  (!%p562_p0), %s556_s27, 512, %s558_s29, %s102_s2  }
  0x2d   : > { %p667_p1 = scmp.lt.s32.totalorder %s473_s11, 3  ;;  %p668_p2 = scmp.ge.s32.totalorder %s473_s11, 1 }
  0x2f   : > { %p120_p5 = pnand %p668_p2, %p667_p1 }
  0x30   : > { %s598_s24 = sand.u32 (!%p120_p5), 1, %s457_s7  }
  0x31   : > { %123 = sbr.rel (%p120_p5) target bundleno = 83 (0x53), region = 24  ;;  %s290_s25 = sshll.u32 (!%p120_p5), %s598_s24, 5 }
  0x32   : > { %s126_s26 = scalar_lea.sflag (!%p120_p5), [#allocation4], %s598_s24  ;;  %s129_s28 = scalar_lea.vmem (!%p120_p5), [#allocation3], %s290_s25 }
  0x38   : > { %444 = dma.done.wait (%p534_p8), %s126_s26, 512  }
  0x39   : > { %446 = vsyncadd (%p534_p8), %s126_s26, 4294966784  ;;  %s147_s27 = scalar_lea.vmem [#allocation6], %s290_s25  ;;  %s298_s30 = sshll.u32 %s465_s9, 9  ;;  %v157_v0 = vld [vmem:[%s129_s28] sm:$0xff]  ;;  %v158_v1 = vld [vmem:[%s129_s28 + $0x8] sm:$0xff] }
  0x3a   : > { %s203_s29 = sshll.u32 %s147_s27, 4  ;;  %v159_v2 = vld [vmem:[%s129_s28 + $0x10] sm:$0xff]  ;;  %s612_s4 = scalar_lea.hbm %s660_s1, %s298_s30  ;;  %184 = vst [vmem:[%s147_s27] sm:$0xff] %v157_v0  ;;  %185 = vst [vmem:[%s147_s27 + $0x8] sm:$0xff] %v158_v1  ;;  %v160_v3 = vld [vmem:[%s129_s28 + $0x18] sm:$0xff]  ;;  %s607_s29 = int_to_ptr.vmem [resolvable:$true] %s203_s29 }
  0x3b   : > { %186 = vst [vmem:[%s147_s27 + $0x10] sm:$0xff] %v159_v2  ;;  %187 = vst [vmem:[%s147_s27 + $0x18] sm:$0xff] %v160_v3  ;;  %s189_s18 = scalar_lea.sflag [#allocation5], %s598_s24  ;;  %s391_s9 = scalar_lea.vmem %s607_s29, 512 }
  0x3c   : > { %p392_p8 = scmp.ne.s32.totalorder %s607_s29, %s391_s9  ;;  %p669_p9 = scmp.ne.s32.totalorder %s664_s19, 0 }
  0x3d   : > { %s476_s5 = smov [#allocation6]  }
  0x3e   : > { %p393_p11 = pnand %p392_p8, %p669_p9  ;;  %s395_s12 = sshll.u32 %s476_s5, 4  ;;  %s396_s12 = int_to_ptr.vmem [resolvable:$false] %s395_s12 }
  0x3f   : > { %s397_s13 = scalar_lea.vmem %s396_s12, 1024  ;;  %p398_p7 = scmp.lt.s32.totalorder %s607_s29, %s396_s12 }
  0x40   : > { %p394_p0 = pneg %p393_p11  ;;  %p399_p13 = scmp.lt.s32.totalorder %s397_s13, %s391_s9 }
  0x42   : > { %p400_p3 = por %p399_p13, %p398_p7 }
  0x44   : > { %p401_p6 = pnand %p400_p3, %p394_p0 }
  0x46   : > { %404 = shalt.err (!%p401_p6)
}
  0x47   : > { %s405_s15 = scalar_lea.hbm %s612_s4, 512  ;;  %s409_s22 = scalar_lea.hbm %s660_s1, 1024 }
  0x48   : > { %p406_p4 = scmp.ne.s32.totalorder %s612_s4, %s405_s15  ;;  %p410_p1 = scmp.lt.u32.totalorder %s612_s4, %s660_s1 }
  0x49   : > { %p411_p2 = scmp.lt.u32.totalorder %s409_s22, %s405_s15  ;;  %p413_p8 = scmp.lt.u32.totalorder %s405_s15, %s612_s4 }
  0x4a   : > { %p407_p10 = pnand %p406_p4, %p669_p9 }
  0x4b   : > { %p412_p5 = por %p411_p2, %p410_p1 }
  0x4c   : > { %p408_p12 = pneg %p407_p10 }
  0x4d   : > { %p414_p11 = por %p413_p8, %p412_p5 }
  0x4f   : > { %p415_p0 = pnand %p414_p11, %p408_p12 }
  0x51   : > { %418 = shalt.err (!%p415_p0)
}
  0x52   : > { %301 = dma.vmem_to_hbm [thread:$0]  (%p669_p9), %s607_s29, 512, %s612_s4, %s189_s18  }
  0x53 PF: > { %s215_s25 = sand.u32 1, %s453_s6   ;;  %p670_p7 = scmp.ne.s32.totalorder %s665_s21, 0 }
  0x54   : > { %p671_p13 = scmp.ge.s32.totalorder %s473_s11, 2  ;;  %s216_s26 = scalar_lea.sflag [#allocation5], %s215_s25 }
  0x56   : > { %p308_p3 = pnand %p671_p13, %p670_p7 }
  0x58   : > { %448 = dma.done.wait (!%p308_p3), %s216_s26, 512  }
  0x59   : > { %450 = vsyncadd (!%p308_p3), %s216_s26, 4294966784  ;;  %s17_s11 = sadd.s32 1, %s473_s11   ;;  %s672_s6 = smov %s457_s7 }
  0x5a   : > { %p14_p6 = scmp.ge.s32.totalorder %s17_s11, 4   ;;  %s673_s7 = smov %s461_s8 }
  0x5b   : > { %s674_s8 = smov %s543_s20  ;;  %s675_s9 = smov %s469_s10 }
  0x5c   : > { %s676_s10 = smov %s678_s14  ;;  %16 = sbr.rel (!%p14_p6) target bundleno = 6 (0x6), region = 77 }
  0x63   :  { %221 = vsyncpa [#allocation4], 1 }
  0x64   :  { %223 = vsyncpa [#allocation4 + $0x1], 1 }
  0x65   :  { %224 = vsyncpa [#allocation5], 1 }
  0x66   :  { %226 = vsyncpa [#allocation5 + $0x1], 1 }

</bundles_post_ra>
